<compile_context>
chip_gen: v5e
topology: v5e:2x2
jax: 0.10.0
libtpu: 0.0.40
codegen_flags: <defaults>
</compile_context>

<pallas_src>
import math

import jax
import jax.numpy as jnp
from jax.experimental import pallas as pl
from jax.experimental.pallas import tpu as pltpu

KSIZE = 5
PAD = 2


def _build_rd_weight(conv_weight, theta):
    # conv_weight: (Cout, Cin, 3, 3) -> radial-difference weight (Cout, Cin, 5, 5)
    cout, cin = conv_weight.shape[0], conv_weight.shape[1]
    w_flat = conv_weight.reshape(cout, cin, 9)
    rd = jnp.zeros((cout, cin, 25), conv_weight.dtype)
    idx_pos = jnp.array([0, 2, 4, 10, 14, 20, 22, 24])
    idx_neg = jnp.array([6, 7, 8, 11, 13, 16, 17, 18])
    rd = rd.at[:, :, idx_pos].set(w_flat[:, :, 1:])
    rd = rd.at[:, :, idx_neg].set(-w_flat[:, :, 1:] * theta)
    rd = rd.at[:, :, 12].set(w_flat[:, :, 0] * (1.0 - theta))
    return rd.reshape(cout, cin, KSIZE, KSIZE)


def _build_toeplitz_weight(w_rd, W):
    """Block-Toeplitz RHS for the lane-dense conv matmul.

    R[kh*Wp*Cin + wp*Cin + ci, w*Cout + co] = w_rd[co, ci, kh, wp - w]
    (zero when wp - w is outside [0, KSIZE)).  Shape: (KSIZE*Wp*Cin, W*Cout).
    """
    cout, cin = w_rd.shape[0], w_rd.shape[1]
    Wp = W + 2 * PAD
    w_t = jnp.transpose(w_rd, (2, 3, 1, 0))  # (kh, kw, ci, co)
    R = jnp.zeros((KSIZE, Wp, cin, W, cout), w_rd.dtype)
    for w in range(W):
        R = R.at[:, w:w + KSIZE, :, w, :].set(w_t)
    return R.reshape(KSIZE * Wp * cin, W * cout)


def _make_rd_kernel(H, W, Cin, Cout):
    Hp, Wp = H + 2 * PAD, W + 2 * PAD
    WpC = Wp * Cin

    def kernel(x_ref, r_ref, o_ref, xp_scr):
        # x_ref : (1, H, W*Cin)          lane-dense unpadded input (one image)
        # r_ref : (KSIZE*Wp*Cin, W*Cout) block-Toeplitz weight (broadcast)
        # o_ref : (1, H, W*Cout)         lane-dense output
        # xp_scr: (Hp, Wp*Cin)           zero-padded input staging (VMEM)

        # Zero-pad inside the kernel: no padded activation round-trip in HBM.
        xp_scr[...] = jnp.zeros_like(xp_scr)
        xp_scr[PAD:PAD + H, PAD * Cin:PAD * Cin + W * Cin] = x_ref[0]

        # All kw taps and input channels are folded into the contraction dim
        # by the Toeplitz RHS: 5 matmuls with M=H, K=Wp*Cin, N=W*Cout, and the
        # accumulator is already in the lane-dense output layout.
        acc = jnp.zeros((H, W * Cout), jnp.float32)
        for kh in range(KSIZE):
            acc = acc + jnp.dot(
                xp_scr[kh:kh + H, :],
                r_ref[kh * WpC:(kh + 1) * WpC, :],
                preferred_element_type=jnp.float32,
            )
        o_ref[0] = acc.astype(o_ref.dtype)

    return kernel


def conv2d_rd_forward(x_nchw, conv_weight, theta=1.0):
    """Forward pass of Conv2d_rd.

    x_nchw:      (N, Cin, H, W)   -- PyTorch NCHW convention
    conv_weight: (Cout, Cin, 3, 3)
    returns:     theta != 0: (N, Cout, H, W)     (5x5 rd kernel, padding=2)
                 theta == 0: (N, Cout, H+2, W+2) (raw 3x3 kernel, padding=2)
    """
    N, Cin, H, W = x_nchw.shape
    Cout = conv_weight.shape[0]

    if math.fabs(theta - 0.0) < 1e-8:
        # TODO(synk): cold branch (module default theta=1.0): plain 3x3 conv
        # with the module's padding=2 kept in XLA to match PyTorch exactly.
        return jax.lax.conv_general_dilated(
            x_nchw, conv_weight,
            window_strides=(1, 1),
            padding=((PAD, PAD), (PAD, PAD)),
            dimension_numbers=("NCHW", "OIHW", "NCHW"),
        )

    w_rd = _build_rd_weight(conv_weight, theta)          # (Cout, Cin, 5, 5)
    r_mat = _build_toeplitz_weight(w_rd, W)               # (5*Wp*Cin, W*Cout)

    # NCHW -> lane-dense (N, H, W*Cin).  (Zero padding happens in the kernel.)
    x_ld = jnp.transpose(x_nchw, (0, 2, 3, 1)).reshape(N, H, W * Cin)

    Hp, Wp = H + 2 * PAD, W + 2 * PAD
    kernel = _make_rd_kernel(H, W, Cin, Cout)

    out_ld = pl.pallas_call(
        kernel,
        out_shape=jax.ShapeDtypeStruct((N, H, W * Cout), x_nchw.dtype),
        grid_spec=pltpu.PrefetchScalarGridSpec(
            num_scalar_prefetch=0,
            grid=(N,),
            in_specs=[
                pl.BlockSpec((1, H, W * Cin), lambda n: (n, 0, 0)),
                pl.BlockSpec((KSIZE * Wp * Cin, W * Cout), lambda n: (0, 0)),
            ],
            out_specs=pl.BlockSpec((1, H, W * Cout), lambda n: (n, 0, 0)),
            scratch_shapes=[pltpu.VMEM((Hp, Wp * Cin), x_nchw.dtype)],
        ),
        compiler_params=pltpu.CompilerParams(
            dimension_semantics=("parallel",),
            vmem_limit_bytes=32 * 1024 * 1024,
        ),
    )(x_ld, r_mat)

    # lane-dense (N, H, W*Cout) -> NCHW
    return jnp.transpose(out_ld.reshape(N, H, W, Cout), (0, 3, 1, 2))


def _reference(x_nchw, conv_weight, theta=1.0):
    w_rd = _build_rd_weight(conv_weight, theta)
    return jax.lax.conv_general_dilated(
        x_nchw, w_rd,
        window_strides=(1, 1),
        padding=((PAD, PAD), (PAD, PAD)),
        dimension_numbers=("NCHW", "OIHW", "NCHW"),
    )


if __name__ == "__main__":
    key = jax.random.PRNGKey(0)
    k_x, k_w = jax.random.split(key)

    N, Cin, H, W = 2, 4, 16, 16
    Cout = 8
    theta = 1.0

    x = jax.random.normal(k_x, (N, Cin, H, W), dtype=jnp.float32)
    # Deterministic "nn.Conv2d" 3x3 weight init (kaiming-uniform-like scale).
    fan_in = Cin * 3 * 3
    bound = 1.0 / math.sqrt(fan_in)
    conv_weight = jax.random.uniform(
        k_w, (Cout, Cin, 3, 3), dtype=jnp.float32, minval=-bound, maxval=bound
    )

    out = conv2d_rd_forward(x, conv_weight, theta=theta)
    out = jax.block_until_ready(out)

    ref = jax.block_until_ready(_reference(x, conv_weight, theta=theta))
    assert out.shape == (N, Cout, H, W), out.shape
    assert jnp.allclose(out, ref, atol=1e-4, rtol=1e-4), "mismatch vs reference"

    print("KERNEL_OK")
</pallas_src>

<mosaic_0001>
module attributes {stable_mosaic.version = 11 : i64} {
  func.func @kernel(%arg0: i32, %arg1: memref<1x16x64xf32, #tpu.memory_space<vmem>>, %arg2: memref<400x128xf32, #tpu.memory_space<vmem>>, %arg3: memref<1x16x128xf32, #tpu.memory_space<vmem>>, %arg4: memref<20x80xf32, #tpu.memory_space<vmem>>) attributes {dimension_semantics = [#tpu.dimension_semantics<parallel>], iteration_bounds = array<i64: 2>, scalar_prefetch = 0 : i64, scratch_operands = 1 : i64, tpu.core_type = #tpu.core_type<tc>, window_params = [{transform_indices = @transform_0, window_bounds = array<i64: 1, 16, 64>}, {pipeline_mode = #tpu.pipeline_mode<synchronous>, transform_indices = @transform_1, window_bounds = array<i64: 400, 128>}, {transform_indices = @transform_2, window_bounds = array<i64: 1, 16, 128>}]} {
    %cst = arith.constant 0.000000e+00 : f32
    %0 = vector.broadcast %cst : f32 to vector<20x80xf32>
    %c0 = arith.constant 0 : index
    %c0_0 = arith.constant 0 : index
    %1 = vector.load %arg4[%c0, %c0_0] : memref<20x80xf32, #tpu.memory_space<vmem>>, vector<20x80xf32>
    tpu.vector_store %arg4[%c0, %c0_0], %0 {strides = array<i32>} : memref<20x80xf32, #tpu.memory_space<vmem>>, vector<20x80xf32>,
    %c0_1 = arith.constant 0 : index
    %c0_2 = arith.constant 0 : index
    %c0_3 = arith.constant 0 : index
    %2 = vector.load %arg1[%c0_1, %c0_2, %c0_3] : memref<1x16x64xf32, #tpu.memory_space<vmem>>, vector<1x16x64xf32>
    %3 = vector.shape_cast %2 : vector<1x16x64xf32> to vector<16x64xf32>
    %c2 = arith.constant 2 : index
    %c8 = arith.constant 8 : index
    %4 = vector.load %arg4[%c2, %c8] : memref<20x80xf32, #tpu.memory_space<vmem>>, vector<16x64xf32>
    tpu.vector_store %arg4[%c2, %c8], %3 {strides = array<i32>} : memref<20x80xf32, #tpu.memory_space<vmem>>, vector<16x64xf32>,
    %cst_4 = arith.constant 0.000000e+00 : f32
    %5 = vector.broadcast %cst_4 : f32 to vector<16x128xf32>
    %c0_5 = arith.constant 0 : index
    %c0_6 = arith.constant 0 : index
    %6 = vector.load %arg4[%c0_5, %c0_6] : memref<20x80xf32, #tpu.memory_space<vmem>>, vector<16x80xf32>
    %c0_7 = arith.constant 0 : index
    %c0_8 = arith.constant 0 : index
    %7 = vector.load %arg2[%c0_7, %c0_8] : memref<400x128xf32, #tpu.memory_space<vmem>>, vector<80x128xf32>
    %cst_9 = arith.constant dense<0.000000e+00> : vector<16x128xf32>
    %8 = tpu.matmul %6, %7, %cst_9 {dimension_numbers = #tpu.dot_dimension_numbers<[1], [0], [0], [1], [0, 0, 1, 1], [], []>} : vector<16x80xf32>, vector<80x128xf32>, vector<16x128xf32> -> vector<16x128xf32>
    %9 = arith.addf %5, %8 : vector<16x128xf32>
    %c1 = arith.constant 1 : index
    %c0_10 = arith.constant 0 : index
    %10 = vector.load %arg4[%c1, %c0_10] : memref<20x80xf32, #tpu.memory_space<vmem>>, vector<16x80xf32>
    %c80 = arith.constant 80 : index
    %c0_11 = arith.constant 0 : index
    %11 = vector.load %arg2[%c80, %c0_11] : memref<400x128xf32, #tpu.memory_space<vmem>>, vector<80x128xf32>
    %cst_12 = arith.constant dense<0.000000e+00> : vector<16x128xf32>
    %12 = tpu.matmul %10, %11, %cst_12 {dimension_numbers = #tpu.dot_dimension_numbers<[1], [0], [0], [1], [0, 0, 1, 1], [], []>} : vector<16x80xf32>, vector<80x128xf32>, vector<16x128xf32> -> vector<16x128xf32>
    %13 = arith.addf %9, %12 : vector<16x128xf32>
    %c2_13 = arith.constant 2 : index
    %c0_14 = arith.constant 0 : index
    %14 = vector.load %arg4[%c2_13, %c0_14] : memref<20x80xf32, #tpu.memory_space<vmem>>, vector<16x80xf32>
    %c160 = arith.constant 160 : index
    %c0_15 = arith.constant 0 : index
    %15 = vector.load %arg2[%c160, %c0_15] : memref<400x128xf32, #tpu.memory_space<vmem>>, vector<80x128xf32>
    %cst_16 = arith.constant dense<0.000000e+00> : vector<16x128xf32>
    %16 = tpu.matmul %14, %15, %cst_16 {dimension_numbers = #tpu.dot_dimension_numbers<[1], [0], [0], [1], [0, 0, 1, 1], [], []>} : vector<16x80xf32>, vector<80x128xf32>, vector<16x128xf32> -> vector<16x128xf32>
    %17 = arith.addf %13, %16 : vector<16x128xf32>
    %c3 = arith.constant 3 : index
    %c0_17 = arith.constant 0 : index
    %18 = vector.load %arg4[%c3, %c0_17] : memref<20x80xf32, #tpu.memory_space<vmem>>, vector<16x80xf32>
    %c240 = arith.constant 240 : index
    %c0_18 = arith.constant 0 : index
    %19 = vector.load %arg2[%c240, %c0_18] : memref<400x128xf32, #tpu.memory_space<vmem>>, vector<80x128xf32>
    %cst_19 = arith.constant dense<0.000000e+00> : vector<16x128xf32>
    %20 = tpu.matmul %18, %19, %cst_19 {dimension_numbers = #tpu.dot_dimension_numbers<[1], [0], [0], [1], [0, 0, 1, 1], [], []>} : vector<16x80xf32>, vector<80x128xf32>, vector<16x128xf32> -> vector<16x128xf32>
    %21 = arith.addf %17, %20 : vector<16x128xf32>
    %c4 = arith.constant 4 : index
    %c0_20 = arith.constant 0 : index
    %22 = vector.load %arg4[%c4, %c0_20] : memref<20x80xf32, #tpu.memory_space<vmem>>, vector<16x80xf32>
    %c320 = arith.constant 320 : index
    %c0_21 = arith.constant 0 : index
    %23 = vector.load %arg2[%c320, %c0_21] : memref<400x128xf32, #tpu.memory_space<vmem>>, vector<80x128xf32>
    %cst_22 = arith.constant dense<0.000000e+00> : vector<16x128xf32>
    %24 = tpu.matmul %22, %23, %cst_22 {dimension_numbers = #tpu.dot_dimension_numbers<[1], [0], [0], [1], [0, 0, 1, 1], [], []>} : vector<16x80xf32>, vector<80x128xf32>, vector<16x128xf32> -> vector<16x128xf32>
    %25 = arith.addf %21, %24 : vector<16x128xf32>
    %c0_23 = arith.constant 0 : index
    %c0_24 = arith.constant 0 : index
    %c0_25 = arith.constant 0 : index
    %26 = vector.load %arg3[%c0_23, %c0_24, %c0_25] : memref<1x16x128xf32, #tpu.memory_space<vmem>>, vector<1x16x128xf32>
    %27 = vector.shape_cast %26 : vector<1x16x128xf32> to vector<16x128xf32>
    %28 = vector.shape_cast %25 : vector<16x128xf32> to vector<1x16x128xf32>
    tpu.vector_store %arg3[%c0_23, %c0_24, %c0_25], %28 {strides = array<i32>} : memref<1x16x128xf32, #tpu.memory_space<vmem>>, vector<1x16x128xf32>,
    return
  }
  func.func @transform_0(%arg0: i32) -> (i32, i32, i32) {
    %c0_i32 = arith.constant 0 : i32
    %c0_i32_0 = arith.constant 0 : i32
    %c0_i32_1 = arith.constant 0 : i32
    return %arg0, %c0_i32, %c0_i32_0 : i32, i32, i32
  }
  func.func @transform_1(%arg0: i32) -> (i32, i32) {
    %c0_i32 = arith.constant 0 : i32
    %c0_i32_0 = arith.constant 0 : i32
    %c0_i32_1 = arith.constant 0 : i32
    return %c0_i32, %c0_i32_0 : i32, i32
  }
  func.func @transform_2(%arg0: i32) -> (i32, i32, i32) {
    %c0_i32 = arith.constant 0 : i32
    %c0_i32_0 = arith.constant 0 : i32
    %c0_i32_1 = arith.constant 0 : i32
    return %arg0, %c0_i32, %c0_i32_0 : i32, i32, i32
  }
}

</mosaic_0001>

<bundles_post_ra>
// kernel: tpu_custom_call.1
= control target key start
LH: loop header
LB: loop body
LE: loop exit
PB: predicated region body
PF: predicated region fallthrough
CT: control target
= control target key end

     0   :  { %7 = vsyncpa [#allocation4], 0  ;;  %s930_s0 = inlined_call_operand.hbm [shape: f32[2,16,64], index: 0, kind: input, shape index: {}]   ;;  %s931_s1 = inlined_call_operand.hbm [shape: f32[400,128], index: 1, kind: input, shape index: {}]   ;;  %s932_s2 = inlined_call_operand.hbm [shape: f32[2,16,128], index: 2, kind: output, shape index: {}]  }
   0x1   :  { %9 = vsyncpa [#allocation4 + $0x1], 0 }
   0x2   :  { %10 = vsyncpa [#allocation7], 0 }
   0x3   :  { %11 = vsyncpa [#allocation5], 0 }
   0x4   :  { %13 = vsyncpa [#allocation5 + $0x1], 0  ;;  %s764_s9 = smov 0   ;;  %s766_s10 = smov 0  }
   0x5   :  { %s768_s11 = smov 0   ;;  %s770_s12 = smov 0  }
   0x6 LB: > { %s785_s13 = sadd.s32 4294967295, %s741_s12   ;;  %s511_s14 = sadd.s32 4294967294, %s741_s12   ;;  %s741_s12 = sphi %s770_s12, %s942_s12   ;;  %s737_s11 = sphi %s768_s11, %s941_s11   ;;  %s733_s10 = sphi %s766_s10, %s940_s10   ;;  %s729_s9 = sphi %s764_s9, %s939_s9  }
   0x7   : > { %p39_p0 = scmp.ne.s32.totalorder %s733_s10, %s729_s9  ;;  %p40_p1 = scmp.eq.s32.totalorder %s785_s13, 0 }
   0x8   : > { %p84_p2 = scmp.eq.s32.totalorder %s785_s13, 1  ;;  %p90_p3 = scmp.eq.s32.totalorder %s511_s14, 1 }
   0x9   : > { %p794_p4 = por %p40_p1, %p39_p0  ;;  %p512_p5 = scmp.ge.s32.totalorder %s741_s12, 1 }
   0xa   : > { %p799_p6 = por %p90_p3, %p39_p0  ;;  %p97_p7 = scmp.lt.s32.totalorder %s741_s12, 3 }
   0xb   : > { %s108_s19 = sshll.u32 %s931_s1, 4  ;;  %s743_s21 = smov [#allocation6]   ;;  %s109_s19 = int_to_ptr.hbm [resolvable:$true] %s108_s19 }
   0xc   : > { %p807_p8 = pnand %p512_p5, %p97_p7  ;;  %s110_s22 = sshll.u32 %s743_s21, 4  ;;  %s111_s22 = int_to_ptr.vmem [resolvable:$true] %s110_s22 }
   0xd   : > { %s817_s23 = sadd.s32 1, %s741_s12   ;;  %s744_s24 = smov 128  }
   0xe   : > { %p557_p9 = pneg %p807_p8  ;;  %s745_s25 = smov 8  }
   0xf   : > { %s23_s26 = ssub.s32 %s741_s12, %s817_s23  ;;  %s26_s27 = sadd.s32 1, %s737_s11 }
  0x10   : > { %p558_p10 = pnand %p557_p9, %p40_p1  ;;  %p24_p12 = scmp.eq.s32.totalorder %s23_s26, 0 }
  0x11   : > { %p33_p13 = scmp.ne.s32.totalorder %s737_s11, %s733_s10  ;;  %p34_p0 = scmp.eq.s32.totalorder %s741_s12, 0 }
  0x12   : > { %560 = dma.hbm_to_vmem [thread:$0]  (!%p558_p10), %s109_s19, 6400, %s111_s22, [#allocation7], %s744_s24, %s744_s24, %s745_s25  }
  0x13   : > { %s829_s28 = scalar_select %p24_p12, %s737_s11, %s26_s27  }
  0x14   : > { %p833_p3 = por %p84_p2, %p33_p13  ;;  %p570_p5 = scmp.lt.s32.totalorder %s741_s12, 2 }
  0x15   : > { %s124_s30 = sand.u32 1, %s737_s11   ;;  %s537_s3 = sshll.u32 %s741_s12, 4 }
  0x16   : > { %p35_p7 = por %p34_p0, %p33_p13  ;;  %s515_s4 = sshll.u32 %s124_s30, 4 }
  0x17   : > { %s133_s7 = scalar_lea.hbm %s930_s0, %s537_s3  ;;  %s128_s14 = scalar_lea.vmem [#allocation3], %s515_s4 }
  0x18   : > { %s134_s8 = sshll.u32 %s133_s7, 4  ;;  %s136_s17 = sshll.u32 %s128_s14, 4  ;;  %s135_s8 = int_to_ptr.hbm [resolvable:$true] %s134_s8  ;;  %s137_s17 = int_to_ptr.vmem [resolvable:$true] %s136_s17 }
  0x19   : > { %p843_p9 = pnand %p570_p5, %p35_p7  ;;  %s125_s19 = scalar_lea.sflag [#allocation4], %s124_s30 }
  0x1a   : > { %s641_s21 = sshra.s32 %s135_s8, 4  ;;  %s648_s3 = scalar_lea.hbm %s930_s0, 32  ;;  %s642_s21 = int_to_ptr.hbm [resolvable:$true] %s641_s21 }
  0x1b   : > { %s643_s22 = scalar_lea.hbm %s642_s21, 16  ;;  %p645_p10 = pneg %p843_p9 }
  0x1c   : > { %p644_p2 = scmp.ne.s32.totalorder %s642_s21, %s643_s22  ;;  %p649_p0 = scmp.lt.s32.totalorder %s642_s21, %s930_s0 }
  0x1d   : > { %p650_p5 = scmp.lt.s32.totalorder %s648_s3, %s643_s22 }
  0x1e   : > { %p646_p12 = pnand %p645_p10, %p644_p2 }
  0x1f   : > { %p651_p7 = por %p650_p5, %p649_p0 }
  0x20   : > { %p647_p13 = pneg %p646_p12 }
  0x22   : > { %p652_p11 = pnand %p651_p7, %p647_p13 }
  0x24   : > { %655 = shalt.err (!%p652_p11)
}
  0x25   : > { %564 = dma.hbm_to_vmem [thread:$0]  (!%p843_p9), %s135_s8, 256, %s137_s17, %s125_s19, %s744_s24, %s744_s24, %s745_s25  }
  0x26   : > { %148 = sbr.rel (%p807_p8) target bundleno = 330 (0x14a), region = 28  ;;  %s863_s30 = sand.u32 (!%p807_p8), 1, %s733_s10  }
  0x27   : > { %s519_s6 = sshll.u32 (!%p807_p8), %s863_s30, 4  ;;  %s151_s7 = scalar_lea.sflag (!%p807_p8), [#allocation4], %s863_s30 }
  0x28   : > { %s154_s14 = scalar_lea.vmem (!%p807_p8), [#allocation3], %s519_s6 }
  0x2b   : > { %716 = dma.done.wait (%p794_p4), %s151_s7, 256  }
  0x2c   : > { %718 = vsyncadd (%p794_p4), %s151_s7, 4294967040 }
  0x2d   : > { %720 = dma.done.wait (%p40_p1), [#allocation7], 6400  }
  0x2e   : > { %722 = vsyncadd (%p40_p1), [#allocation7], 4294960896  ;;  %vm181_vm0 = vcmask 654336   ;;  %v746_v0 = vmov 0.0   ;;  %v186_v1 = vld [vmem:[%s154_s14] sm:$0xff]  ;;  %v222_v2 = vld [vmem:[#allocation6 + $0x98] sm:$0xff] }
  0x2f   : > { %182 = vst.msk [vmem:[#allocation2] sm:$0xff] %vm181_vm0, %v746_v0  ;;  %s747_s20 = smov 8   ;;  %235 = vmatpush.msra.mxu0 %v222_v2  ;;  %v210_v3 = vld [vmem:[#allocation6 + $0x48] sm:$0xff]  ;;  %v221_v4 = vld [vmem:[#allocation6 + $0x90] sm:$0xff]  ;;  %v209_v5 = vld [vmem:[#allocation6 + $0x40] sm:$0xff]  ;;  %vm184_vm1 = vcmask 650240  }
  0x30   : > { %183 = vst.msk [vmem:[#allocation2 + $0x8] sm:$0xff] %vm181_vm0, %v746_v0  ;;  %190 = vrot.lane.b32.xlu0 %v186_v1, %s747_s20  ;;  %264 = vmatpush.msra.mxu1 %v210_v3  ;;  %v292_v6 = vld [vmem:[#allocation6 + $0xe8] sm:$0xff]  ;;  %v208_v8 = vld [vmem:[#allocation6 + $0x38] sm:$0xff]  ;;  %v291_v9 = vld [vmem:[#allocation6 + $0xe0] sm:$0xff]  ;;  %vm196_vm2 = vcmask 588864   ;;  %s538_s15 = sshll.u32 %s785_s13, 4 }
  0x31   : > { %v220_v7 = vld [vmem:[#allocation6 + $0x88] sm:$0xff]  ;;  %236 = vmatpush.msra.mxu0 %v221_v4  ;;  %305 = vmatpush.msra.mxu2 %v292_v6  ;;  %v219_v10 = vld [vmem:[#allocation6 + $0x80] sm:$0xff]  ;;  %v290_v11 = vld [vmem:[#allocation6 + $0xd8] sm:$0xff]  ;;  %185 = vst.msk [vmem:[#allocation2 + $0x10] sm:$0xf] %vm184_vm1, %v746_v0  ;;  %s180_s24 = scalar_lea.vmem [#allocation8], %s519_s6  ;;  %s424_s17 = scalar_lea.hbm %s932_s2, %s538_s15 }
  0x32   : > { %265 = vmatpush.msra.mxu1 %v209_v5  ;;  %v207_v12 = vld [vmem:[#allocation6 + $0x30] sm:$0xff]  ;;  %v187_v13 = vld [vmem:[%s154_s14 + $0x8] sm:$0xff]  ;;  %v205_v20 = vld [vmem:[#allocation6 + $0x20] sm:$0xff]  ;;  %s425_s18 = sshll.u32 %s180_s24, 4  ;;  %s427_s19 = sshll.u32 %s424_s17, 4  ;;  %s426_s18 = int_to_ptr.vmem [resolvable:$true] %s425_s18  ;;  %s428_s19 = int_to_ptr.hbm [resolvable:$true] %s427_s19 }
  0x33   : > { %237 = vmatpush.msra.mxu0 %v220_v7  ;;  %306 = vmatpush.msra.mxu2 %v291_v9  ;;  %v218_v14 = vld [vmem:[#allocation6 + $0x78] sm:$0xff]  ;;  %v206_v16 = vld [vmem:[#allocation6 + $0x28] sm:$0xff]  ;;  %v289_v17 = vld [vmem:[#allocation6 + $0xd0] sm:$0xff]  ;;  %s413_s13 = scalar_lea.sflag [#allocation5], %s863_s30  ;;  %s685_s21 = sshra.s32 %s428_s19, 4  ;;  %s686_s21 = int_to_ptr.hbm [resolvable:$true] %s685_s21 }
  0x34   : > { %266 = vmatpush.msra.mxu1 %v208_v8  ;;  %v335_v15 = vld [vmem:[#allocation6 + $0x138] sm:$0xff]  ;;  %v217_v18 = vld [vmem:[#allocation6 + $0x70] sm:$0xff]  ;;  %v288_v21 = vld [vmem:[#allocation6 + $0xc8] sm:$0xff]  ;;  %s687_s22 = scalar_lea.hbm %s686_s21, 16  ;;  %s691_s3 = scalar_lea.hbm %s932_s2, 32 }
  0x35   : > { %238 = vmatpush.msra.mxu0 %v219_v10  ;;  %307 = vmatpush.msra.mxu2 %v290_v11  ;;  %v334_v19 = vld [vmem:[#allocation6 + $0x130] sm:$0xff]  ;;  %v216_v22 = vld [vmem:[#allocation6 + $0x68] sm:$0xff]  ;;  %v204_v23 = vld [vmem:[#allocation6 + $0x18] sm:$0xff]  ;;  %p688_p1 = scmp.ne.s32.totalorder %s686_s21, %s687_s22  ;;  %p692_p11 = scmp.lt.s32.totalorder %s686_s21, %s932_s2 }
  0x36   : > { %267 = vmatpush.msra.mxu1 %v207_v12  ;;  %348 = vmatpush.msra.mxu3 %v335_v15  ;;  %v287_v24 = vld [vmem:[#allocation6 + $0xc0] sm:$0xff]  ;;  %v203_v26 = vld [vmem:[#allocation6 + $0x10] sm:$0xff]  ;;  %v286_v27 = vld [vmem:[#allocation6 + $0xb8] sm:$0xff]  ;;  %p693_p9 = scmp.lt.s32.totalorder %s691_s3, %s687_s22 }
  0x37   : > { %239 = vmatpush.msra.mxu0 %v218_v14  ;;  %308 = vmatpush.msra.mxu2 %v289_v17  ;;  %v215_v25 = vld [vmem:[#allocation6 + $0x60] sm:$0xff]  ;;  %v333_v28 = vld [vmem:[#allocation6 + $0x128] sm:$0xff]  ;;  %v214_v29 = vld [vmem:[#allocation6 + $0x58] sm:$0xff]  ;;  %p689_p4 = pnand %p688_p1, %p833_p3 }
  0x38   : > { %192 = vrot.lane.b32.xlu0 %v187_v13, %s747_s20  ;;  %268 = vmatpush.msra.mxu1 %v206_v16  ;;  %v202_v30 = vld [vmem:[#allocation6 + $0x8] sm:$0xff]  ;;  %v285_v31 = vld [vmem:[#allocation6 + $0xb0] sm:$0xff]  ;;  %v332_v32 = vld [vmem:[#allocation6 + $0x120] sm:$0xff]  ;;  %p694_p2 = por %p693_p9, %p692_p11 }
  0x39   : > { %240 = vmatpush.msra.mxu0 %v217_v18  ;;  %349 = vmatpush.msra.mxu3 %v334_v19  ;;  %v213_v33 = vld [vmem:[#allocation6 + $0x50] sm:$0xff]  ;;  %v201_v34 = vld [vmem:[#allocation6] sm:$0xff]  ;;  %v284_v35 = vld [vmem:[#allocation6 + $0xa8] sm:$0xff]  ;;  %p690_p8 = pneg %p689_p4 }
  0x3a   : > { %269 = vmatpush.msra.mxu1 %v205_v20  ;;  %309 = vmatpush.msra.mxu2 %v288_v21  ;;  %v331_v36 = vld [vmem:[#allocation6 + $0x118] sm:$0xff]  ;;  %v378_v37 = vld [vmem:[#allocation6 + $0x188] sm:$0xff]  ;;  %v283_v38 = vld [vmem:[#allocation6 + $0xa0] sm:$0xff] }
  0x3b   : > { %241 = vmatpush.msra.mxu0 %v216_v22  ;;  %350 = vmatpush.msra.mxu3 %v333_v28  ;;  %v330_v39 = vld [vmem:[#allocation6 + $0x110] sm:$0xff]  ;;  %v377_v40 = vld [vmem:[#allocation6 + $0x180] sm:$0xff]  ;;  %v329_v41 = vld [vmem:[#allocation6 + $0x108] sm:$0xff]  ;;  %p695_p10 = pnand %p694_p2, %p690_p8 }
  0x3c   : > { %270 = vmatpush.msra.mxu1 %v204_v23  ;;  %310 = vmatpush.msra.mxu2 %v287_v24  ;;  %v376_v42 = vld [vmem:[#allocation6 + $0x178] sm:$0xff]  ;;  %v328_v43 = vld [vmem:[#allocation6 + $0x100] sm:$0xff]  ;;  %v375_v44 = vld [vmem:[#allocation6 + $0x170] sm:$0xff] }
  0x3d   : > { %242 = vmatpush.msra.mxu0 %v215_v25  ;;  %351 = vmatpush.msra.mxu3 %v332_v32  ;;  %v327_v45 = vld [vmem:[#allocation6 + $0xf8] sm:$0xff]  ;;  %v374_v46 = vld [vmem:[#allocation6 + $0x168] sm:$0xff]  ;;  %v326_v47 = vld [vmem:[#allocation6 + $0xf0] sm:$0xff] }
  0x3e   : > { %271 = vmatpush.msra.mxu1 %v203_v26  ;;  %311 = vmatpush.msra.mxu2 %v286_v27  ;;  %v373_v48 = vld [vmem:[#allocation6 + $0x160] sm:$0xff]  ;;  %v372_v49 = vld [vmem:[#allocation6 + $0x158] sm:$0xff]  ;;  %v371_v50 = vld [vmem:[#allocation6 + $0x150] sm:$0xff] }
  0x3f   : > { %243 = vmatpush.msra.mxu0 %v214_v29  ;;  %352 = vmatpush.msra.mxu3 %v331_v36  ;;  %v370_v51 = vld [vmem:[#allocation6 + $0x148] sm:$0xff]  ;;  %v369_v52 = vld [vmem:[#allocation6 + $0x140] sm:$0xff] }
  0x40   : > { %272 = vmatpush.msra.mxu1 %v202_v30  ;;  %312 = vmatpush.msra.mxu2 %v285_v31 }
  0x41   : > { %244 = vmatpush.msra.mxu0 %v213_v33  ;;  %353 = vmatpush.msra.mxu3 %v330_v39 }
  0x42   : > { %273 = vmatpush.msra.mxu1 %v201_v34  ;;  %313 = vmatpush.msra.mxu2 %v284_v35 }
  0x43   : > { %391 = vmatpush.msrb.mxu0 %v378_v37  ;;  %354 = vmatpush.msra.mxu3 %v329_v41 }
  0x44   : > { %539 = vmatpush.msrb.mxu1 %v378_v37  ;;  %314 = vmatpush.msra.mxu2 %v283_v38 }
  0x45   : > { %392 = vmatpush.msrb.mxu0 %v377_v40  ;;  %355 = vmatpush.msra.mxu3 %v328_v43 }
  0x46   : > { %540 = vmatpush.msrb.mxu1 %v377_v40 }
  0x47   : > { %393 = vmatpush.msrb.mxu0 %v376_v42  ;;  %356 = vmatpush.msra.mxu3 %v327_v45 }
  0x48   : > { %541 = vmatpush.msrb.mxu1 %v376_v42 }
  0x49   : > { %394 = vmatpush.msrb.mxu0 %v375_v44  ;;  %357 = vmatpush.msra.mxu3 %v326_v47 }
  0x4a   : > { %542 = vmatpush.msrb.mxu1 %v375_v44 }
  0x4b   : > { %395 = vmatpush.msrb.mxu0 %v374_v46 }
  0x4c   : > { %543 = vmatpush.msrb.mxu1 %v374_v46 }
  0x4d   : > { %396 = vmatpush.msrb.mxu0 %v373_v48 }
  0x4e   : > { %544 = vmatpush.msrb.mxu1 %v373_v48 }
  0x4f   : > { %397 = vmatpush.msrb.mxu0 %v372_v49 }
  0x50   : > { %545 = vmatpush.msrb.mxu1 %v372_v49 }
  0x51   : > { %398 = vmatpush.msrb.mxu0 %v371_v50 }
  0x52   : > { %546 = vmatpush.msrb.mxu1 %v371_v50 }
  0x53   : > { %399 = vmatpush.msrb.mxu0 %v370_v51 }
  0x54   : > { %547 = vmatpush.msrb.mxu1 %v370_v51 }
  0x55   : > { %400 = vmatpush.msrb.mxu0 %v369_v52 }
  0x56   : > { %548 = vmatpush.msrb.mxu1 %v369_v52 }
  0xa2   : > { %v191_v53 = vpop.permute.xlu0 %190 }
  0xa3   : > { %197 = vst.msk [vmem:[#allocation2 + $0x2] sm:$0xff] %vm196_vm2, %v191_v53 }
  0xaa   : > { %v193_v54 = vpop.permute.xlu0 %192  ;;  %v211_v55 = vld [vmem:[#allocation2 + $0x1] sm:$0xff] }
  0xab   : > { %v199_v56 = vld [vmem:[#allocation2] sm:$0xff]  ;;  %198 = vst.msk [vmem:[#allocation2 + $0xa] sm:$0xff] %vm196_vm2, %v193_v54  ;;  %522 = vmatmul.msk.f32.vlgmr.msra.gmra.mxu0 %vm181_vm0, %v211_v55 }
  0xac   : > { %v281_v57 = vld [vmem:[#allocation2 + $0x2] sm:$0xff]  ;;  %524 = vmatmul.msk.f32.vlgmr.msra.gmra.mxu1 %vm181_vm0, %v199_v56 }
  0xad   : > { %526 = vmatmul.msk.f32.vlgmr.msra.gmra.mxu2 %vm181_vm0, %v281_v57 }
  0xb2   : > { %v212_v58 = vld [vmem:[#allocation2 + $0x9] sm:$0xff] }
  0xb3   : > { %v200_v59 = vld [vmem:[#allocation2 + $0x8] sm:$0xff]  ;;  %523 = vmatmul.msk.f32.gmra.mxu0 %vm181_vm0, %v212_v58 }
  0xb4   : > { %v282_v60 = vld [vmem:[#allocation2 + $0xa] sm:$0xff]  ;;  %525 = vmatmul.msk.f32.gmra.mxu1 %vm181_vm0, %v200_v59 }
  0xb5   : > { %v324_v61 = vld [vmem:[#allocation2 + $0x3] sm:$0xff]  ;;  %527 = vmatmul.msk.f32.gmra.mxu2 %vm181_vm0, %v282_v60  ;;  %v368_v63 = vld [vmem:[#allocation2 + $0xc] sm:$0xff] }
  0xb6   : > { %528 = vmatmul.msk.f32.vlgmr.msra.gmra.mxu3 %vm181_vm0, %v324_v61  ;;  %v367_v62 = vld [vmem:[#allocation2 + $0x4] sm:$0xff] }
  0xb7   : > { %v325_v0 = vld [vmem:[#allocation2 + $0xb] sm:$0xff] }
  0xbb   : > { %530 = vmatmul.msk.f32.vlgmr.msrb.gmra.mxu0 %vm181_vm0, %v367_v62 }
  0xbc   : > { %531 = vmatmul.msk.f32.vlgmr.msrb.gmra.mxu1 %vm181_vm0, %v368_v63 }
  0xbe   : > { %529 = vmatmul.msk.f32.gmra.mxu3 %vm181_vm0, %v325_v0 }
 0x128   : > { %v246_v1 = vpop.f32.mrf.mxu0 }
 0x129   : > { %v275_v2 = vpop.f32.mrf.mxu1 }
 0x12a   : > { %v276_v5 = vadd.f32 %v275_v2, %v246_v1 }
 0x130   : > { %v249_v3 = vpop.f32.mrf.mxu0  ;;  %v316_v4 = vpop.f32.mrf.mxu2 }
 0x131   : > { %v322_v6 = vadd.f32 %v316_v4, %v276_v5  ;;  %v278_v7 = vpop.f32.mrf.mxu1 }
 0x132   : > { %v279_v13 = vadd.f32 %v278_v7, %v249_v3 }
 0x138   : > { %v402_v10 = vpop.f32.mrf.mxu0  ;;  %v319_v12 = vpop.f32.mrf.mxu2 }
 0x139   : > { %v359_v8 = vpop.f32.mrf.mxu3  ;;  %v323_v14 = vadd.f32 %v319_v12, %v279_v13  ;;  %v405_v17 = vpop.f32.mrf.mxu1 }
 0x13a   : > { %v365_v9 = vadd.f32 %v359_v8, %v322_v6 }
 0x13c   : > { %v408_v11 = vadd.f32 %v402_v10, %v365_v9 }
 0x13e   : > { %410 = vst [vmem:[%s180_s24] sm:$0xff] %v408_v11 }
 0x141   : > { %v362_v15 = vpop.f32.mrf.mxu3 }
 0x142   : > { %v366_v16 = vadd.f32 %v362_v15, %v323_v14 }
 0x144   : > { %v409_v18 = vadd.f32 %v405_v17, %v366_v16 }
 0x146   : > { %411 = vst [vmem:[%s180_s24 + $0x8] sm:$0xff] %v409_v18 }
 0x147   : > { %698 = shalt.err (!%p695_p10)
}
 0x148   : > { %s748_s30 = smov 128  }
 0x149   : > { %555 = dma.vmem_to_hbm [thread:$0]  (%p833_p3), %s426_s18, 256, %s428_s19, %s413_s13, %s748_s30, %s748_s30, %s747_s20  }
 0x14a PF: > { %s442_s6 = sand.u32 1, %s729_s9   ;;  %p938_p12 = scmp.ge.s32.totalorder %s741_s12, 2 }
 0x14b   : > { %s443_s7 = scalar_lea.sflag [#allocation5], %s442_s6 }
 0x14c   : > { %p566_p13 = pnand %p938_p12, %p799_p6 }
 0x14e   : > { %p567_p0 = pneg %p566_p13 }
 0x150   : > { %724 = dma.done.wait (%p567_p0), %s443_s7, 256  }
 0x151   : > { %726 = vsyncadd (%p567_p0), %s443_s7, 4294967040  ;;  %p16_p5 = scmp.ge.s32.totalorder %s817_s23, 4   ;;  %s939_s9 = smov %s733_s10 }
 0x152   : > { %s940_s10 = smov %s737_s11  ;;  %s941_s11 = smov %s829_s28 }
 0x153   : > { %s942_s12 = smov %s817_s23  ;;  %18 = sbr.rel (!%p16_p5) target bundleno = 6 (0x6), region = 77 }
 0x158   :  { %449 = vsyncpa [#allocation4], 1 }
 0x159   :  { %451 = vsyncpa [#allocation4 + $0x1], 1 }
 0x15a   :  { %452 = vsyncpa [#allocation7], 1 }
 0x15b   :  { %453 = vsyncpa [#allocation5], 1 }
 0x15c   :  { %455 = vsyncpa [#allocation5 + $0x1], 1 }

</bundles_post_ra>
